<compile_context>
chip_gen: v6e
topology: v6e:2x2x1
jax: 0.10.0
libtpu: 0.0.40
codegen_flags: <defaults>
</compile_context>

<pallas_src>
import functools

import jax
import jax.numpy as jnp
from jax import lax
from jax.experimental import pallas as pl
from jax.experimental.pallas import tpu as pltpu

HIDDEN = 1            # hidden_size in the PyTorch module (kernel assumes H == 1)
FC_OUT = 4 * HIDDEN   # fc1 output size == GRU input size


def _fused_kernel(x_ref,                              # VMEM (T, NB) f32
                  w1_ref, b1_ref,                     # SMEM (4,), (4,)
                  wih_ref, whh_ref, bih_ref, bhh_ref, # SMEM (24,), (6,), (6,), (6,)
                  out_ref,                            # VMEM (2T, NB): [0,T) fwd, [T,2T) bwd
                  gates_ref,                          # VMEM scratch (2T, 3*NB): lanes r|z|n
                  *, ch):
    T, NB = x_ref.shape
    F = FC_OUT

    # ---- fc1 + ReLU + hoisted x-dependent gate projections (pure VPU) ------
    x2 = x_ref[...]                                                  # (T, NB)
    y = [jnp.maximum(x2 * w1_ref[f] + b1_ref[f], 0.0) for f in range(F)]
    for d in range(2):                  # 0 = forward, 1 = backward direction
        for g in range(3):              # r, z, n (PyTorch gate order)
            acc = y[0] * wih_ref[d * 12 + g * 4 + 0]
            for f in range(1, F):
                acc = acc + y[f] * wih_ref[d * 12 + g * 4 + f]
            acc = acc + bih_ref[d * 3 + g]
            if g < 2:                   # fold b_hh into r/z; b_hn stays inside r*(...)
                acc = acc + bhh_ref[d * 3 + g]
            gates_ref[d * T:(d + 1) * T, g * NB:(g + 1) * NB] = acc

    # Hidden-to-hidden weights are scalars (H == 1); read from SMEM once.
    Whr = [whh_ref[d * 3 + 0] for d in range(2)]
    Whz = [whh_ref[d * 3 + 1] for d in range(2)]
    Whn = [whh_ref[d * 3 + 2] for d in range(2)]
    Bhn = [bhh_ref[d * 3 + 2] for d in range(2)]

    def step(d, t, h):                                   # h: (1, NB)
        row = gates_ref[pl.ds(d * T + t, 1), :]          # (1, 3*NB): r | z | n
        a_r = row[:, 0:NB]
        a_z = row[:, NB:2 * NB]
        a_n = row[:, 2 * NB:3 * NB]
        r = jax.nn.sigmoid(a_r + h * Whr[d])
        z = jax.nn.sigmoid(a_z + h * Whz[d])
        n = jnp.tanh(a_n + r * (h * Whn[d] + Bhn[d]))
        return n + z * (h - n)                           # == (1-z)*n + z*h

    n_chunks = T // ch                                   # wrapper ensures ch | T

    def chunk_body(c, carry):
        h_f, h_b = carry
        base_f = pl.multiple_of(c * ch, ch)
        rows_f, rows_b = [], []
        for i in range(ch):                              # interleaved fwd/bwd ILP
            t_f = base_f + i
            t_b = (T - 1) - base_f - i
            h_f = step(0, t_f, h_f)
            h_b = step(1, t_b, h_b)
            rows_f.append(h_f)
            rows_b.append(h_b)
        # One CH-row, lane-dense store per direction per chunk.
        out_ref[pl.ds(base_f, ch), :] = jnp.concatenate(rows_f, axis=0)
        base_b = pl.multiple_of(2 * T - (c + 1) * ch, ch)
        out_ref[pl.ds(base_b, ch), :] = jnp.concatenate(rows_b[::-1], axis=0)
        return (h_f, h_b)

    h0 = jnp.zeros((1, NB), jnp.float32)
    lax.fori_loop(0, n_chunks, chunk_body, (h0, h0))


def my_module1_forward(x, params, *, lane_block=128):
    """x: (T, N, 1) float32 -> (T, N, 2*HIDDEN) float32 (matches PyTorch output).

    T = time (GRU batch_first=False), N = batch.
    """
    T, N, f_in = x.shape
    assert f_in == HIDDEN == 1, "kernel is specialized to hidden_size == 1"
    assert lane_block % 128 == 0
    NB = lane_block

    x2d = x.reshape(T, N).astype(jnp.float32)
    n_pad = pl.cdiv(N, NB) * NB
    if n_pad != N:                       # lane-dense padding; trimmed after the call
        x2d = jnp.pad(x2d, ((0, 0), (0, n_pad - N)))
    n_blocks = n_pad // NB
    ch = next(c for c in (8, 4, 2, 1) if T % c == 0)

    # Per-block VMEM residency: x (x2 buf) + out (x2 buf) + gate scratch + headroom.
    per_arr = 4 * T * NB
    est_bytes = per_arr * (2 * 1 + 2 * 2 + 6 + 8)
    vmem_limit = 32 * 1024 * 1024
    assert est_bytes <= vmem_limit, (
        f"T ({T}) too large for a single lane block; est={est_bytes} bytes")

    smem = pl.BlockSpec(memory_space=pltpu.MemorySpace.SMEM)
    out = pl.pallas_call(
        functools.partial(_fused_kernel, ch=ch),
        out_shape=jax.ShapeDtypeStruct((2 * T, n_pad), jnp.float32),
        grid=(n_blocks,),
        in_specs=[pl.BlockSpec((T, NB), lambda j: (0, j)),
                  smem, smem, smem, smem, smem, smem],
        out_specs=pl.BlockSpec((2 * T, NB), lambda j: (0, j)),
        scratch_shapes=[pltpu.VMEM((2 * T, 3 * NB), jnp.float32)],
        compiler_params=pltpu.CompilerParams(
            dimension_semantics=("parallel",),
            vmem_limit_bytes=vmem_limit),
    )(x2d, params["w1"], params["b1"], params["wih"], params["whh"],
      params["bih"], params["bhh"])

    out = out[:, :N]                                     # trim lane padding
    # (2*T, N) -> (T, N, 2): [..., 0] = forward, [..., 1] = backward
    return jnp.transpose(out.reshape(2, T, N), (1, 2, 0))


def make_params(key):
    ks = jax.random.split(key, 10)
    u = lambda k, shape: jax.random.uniform(k, shape, jnp.float32, -0.5, 0.5)
    H, F = HIDDEN, FC_OUT
    # fc1: weight (4, 1), bias (4,)
    w1 = u(ks[0], (F, H))
    b1 = u(ks[1], (F,))
    # GRU (gate order r, z, n like PyTorch): W_ih (3H, 4), W_hh (3H, H), biases (3H,)
    wih_f = u(ks[2], (3 * H, F)); whh_f = u(ks[3], (3 * H, H))
    bih_f = u(ks[4], (3 * H,));   bhh_f = u(ks[5], (3 * H,))
    wih_b = u(ks[6], (3 * H, F)); whh_b = u(ks[7], (3 * H, H))
    bih_b = u(ks[8], (3 * H,));   bhh_b = u(ks[9], (3 * H,))
    kernel_params = {
        "w1":  w1[:, 0],                                                   # (4,)
        "b1":  b1,                                                         # (4,)
        "wih": jnp.concatenate([wih_f.reshape(-1), wih_b.reshape(-1)]),    # (24,)
        "whh": jnp.concatenate([whh_f.reshape(-1), whh_b.reshape(-1)]),    # (6,)
        "bih": jnp.concatenate([bih_f, bih_b]),                            # (6,)
        "bhh": jnp.concatenate([bhh_f, bhh_b]),                            # (6,)
    }
    raw = dict(w1=w1, b1=b1,
               wih_f=wih_f, whh_f=whh_f, bih_f=bih_f, bhh_f=bhh_f,
               wih_b=wih_b, whh_b=whh_b, bih_b=bih_b, bhh_b=bhh_b)
    return kernel_params, raw


def _reference(x, raw):
    """Pure-JAX reference of the module forward (relu(fc1) -> bidirectional GRU)."""
    H = HIDDEN
    y = jnp.maximum(x @ raw["w1"].T + raw["b1"], 0.0)            # (T, N, 4)

    def run(wih, whh, bih, bhh, reverse):
        def cell(h, x_t):                                        # h (N,H), x_t (N,4)
            gi = x_t @ wih.T + bih
            gh = h @ whh.T + bhh
            r = jax.nn.sigmoid(gi[:, 0:H] + gh[:, 0:H])
            z = jax.nn.sigmoid(gi[:, H:2 * H] + gh[:, H:2 * H])
            n = jnp.tanh(gi[:, 2 * H:] + r * gh[:, 2 * H:])
            h_new = (1.0 - z) * n + z * h
            return h_new, h_new
        ys = y[::-1] if reverse else y
        h0 = jnp.zeros((y.shape[1], H), jnp.float32)
        _, hs = jax.lax.scan(cell, h0, ys)
        return hs[::-1] if reverse else hs

    hf = run(raw["wih_f"], raw["whh_f"], raw["bih_f"], raw["bhh_f"], False)
    hb = run(raw["wih_b"], raw["whh_b"], raw["bih_b"], raw["bhh_b"], True)
    return jnp.concatenate([hf, hb], axis=-1)                    # (T, N, 2H)


if __name__ == "__main__":
    key = jax.random.PRNGKey(0)
    kx, kp, kx2 = jax.random.split(key, 3)
    params, raw = make_params(kp)

    # Shape from the original test harness: (2, 8, 1); dim 0 = time, dim 1 = batch.
    B, S = 2, 8
    x = jax.random.normal(kx, (B, S, HIDDEN), jnp.float32)
    out = jax.block_until_ready(my_module1_forward(x, params))
    assert out.shape == (B, S, 2 * HIDDEN), out.shape
    ref = jax.block_until_ready(_reference(x, raw))
    assert jnp.allclose(out, ref, rtol=1e-4, atol=1e-4), \
        float(jnp.max(jnp.abs(out - ref)))

    # Larger case exercising the lane grid (2 blocks), padding trim, and the
    # chunked (8-step) batched stores in the recurrence.
    x2 = jax.random.normal(kx2, (16, 200, HIDDEN), jnp.float32)
    out2 = jax.block_until_ready(my_module1_forward(x2, params))
    assert out2.shape == (16, 200, 2 * HIDDEN), out2.shape
    ref2 = jax.block_until_ready(_reference(x2, raw))
    assert jnp.allclose(out2, ref2, rtol=1e-4, atol=1e-4), \
        float(jnp.max(jnp.abs(out2 - ref2)))

    print("KERNEL_OK")
</pallas_src>

<mosaic_0001>
module attributes {stable_mosaic.version = 11 : i64} {
  func.func @_fused_kernel(%arg0: i32, %arg1: memref<2x128xf32, #tpu.memory_space<vmem>>, %arg2: memref<4xf32, #tpu.memory_space<smem>>, %arg3: memref<4xf32, #tpu.memory_space<smem>>, %arg4: memref<24xf32, #tpu.memory_space<smem>>, %arg5: memref<6xf32, #tpu.memory_space<smem>>, %arg6: memref<6xf32, #tpu.memory_space<smem>>, %arg7: memref<6xf32, #tpu.memory_space<smem>>, %arg8: memref<4x128xf32, #tpu.memory_space<vmem>>, %arg9: memref<4x384xf32, #tpu.memory_space<vmem>>) attributes {dimension_semantics = [#tpu.dimension_semantics<parallel>], iteration_bounds = array<i64: 1>, scalar_prefetch = 0 : i64, scratch_operands = 1 : i64, tpu.core_type = #tpu.core_type<tc>, window_params = [{transform_indices = @transform_0, window_bounds = array<i64: 2, 128>}, {transform_indices = @transform_1, window_bounds = array<i64: 4>}, {transform_indices = @transform_2, window_bounds = array<i64: 4>}, {transform_indices = @transform_3, window_bounds = array<i64: 24>}, {transform_indices = @transform_4, window_bounds = array<i64: 6>}, {transform_indices = @transform_5, window_bounds = array<i64: 6>}, {transform_indices = @transform_6, window_bounds = array<i64: 6>}, {transform_indices = @transform_7, window_bounds = array<i64: 4, 128>}]} {
    %c0 = arith.constant 0 : index
    %c0_0 = arith.constant 0 : index
    %0 = vector.load %arg1[%c0, %c0_0] : memref<2x128xf32, #tpu.memory_space<vmem>>, vector<2x128xf32>
    %c0_1 = arith.constant 0 : index
    %1 = memref.load %arg2[%c0_1] : memref<4xf32, #tpu.memory_space<smem>>
    %2 = vector.broadcast %1 : f32 to vector<2x128xf32>
    %3 = arith.mulf %0, %2 : vector<2x128xf32>
    %c0_2 = arith.constant 0 : index
    %4 = memref.load %arg3[%c0_2] : memref<4xf32, #tpu.memory_space<smem>>
    %5 = vector.broadcast %4 : f32 to vector<2x128xf32>
    %6 = arith.addf %3, %5 : vector<2x128xf32>
    %cst = arith.constant 0.000000e+00 : f32
    %7 = vector.broadcast %cst : f32 to vector<2x128xf32>
    %8 = arith.maximumf %6, %7 : vector<2x128xf32>
    %c1 = arith.constant 1 : index
    %9 = memref.load %arg2[%c1] : memref<4xf32, #tpu.memory_space<smem>>
    %10 = vector.broadcast %9 : f32 to vector<2x128xf32>
    %11 = arith.mulf %0, %10 : vector<2x128xf32>
    %c1_3 = arith.constant 1 : index
    %12 = memref.load %arg3[%c1_3] : memref<4xf32, #tpu.memory_space<smem>>
    %13 = vector.broadcast %12 : f32 to vector<2x128xf32>
    %14 = arith.addf %11, %13 : vector<2x128xf32>
    %cst_4 = arith.constant 0.000000e+00 : f32
    %15 = vector.broadcast %cst_4 : f32 to vector<2x128xf32>
    %16 = arith.maximumf %14, %15 : vector<2x128xf32>
    %c2 = arith.constant 2 : index
    %17 = memref.load %arg2[%c2] : memref<4xf32, #tpu.memory_space<smem>>
    %18 = vector.broadcast %17 : f32 to vector<2x128xf32>
    %19 = arith.mulf %0, %18 : vector<2x128xf32>
    %c2_5 = arith.constant 2 : index
    %20 = memref.load %arg3[%c2_5] : memref<4xf32, #tpu.memory_space<smem>>
    %21 = vector.broadcast %20 : f32 to vector<2x128xf32>
    %22 = arith.addf %19, %21 : vector<2x128xf32>
    %cst_6 = arith.constant 0.000000e+00 : f32
    %23 = vector.broadcast %cst_6 : f32 to vector<2x128xf32>
    %24 = arith.maximumf %22, %23 : vector<2x128xf32>
    %c3 = arith.constant 3 : index
    %25 = memref.load %arg2[%c3] : memref<4xf32, #tpu.memory_space<smem>>
    %26 = vector.broadcast %25 : f32 to vector<2x128xf32>
    %27 = arith.mulf %0, %26 : vector<2x128xf32>
    %c3_7 = arith.constant 3 : index
    %28 = memref.load %arg3[%c3_7] : memref<4xf32, #tpu.memory_space<smem>>
    %29 = vector.broadcast %28 : f32 to vector<2x128xf32>
    %30 = arith.addf %27, %29 : vector<2x128xf32>
    %cst_8 = arith.constant 0.000000e+00 : f32
    %31 = vector.broadcast %cst_8 : f32 to vector<2x128xf32>
    %32 = arith.maximumf %30, %31 : vector<2x128xf32>
    %c0_9 = arith.constant 0 : index
    %33 = memref.load %arg4[%c0_9] : memref<24xf32, #tpu.memory_space<smem>>
    %34 = vector.broadcast %33 : f32 to vector<2x128xf32>
    %35 = arith.mulf %8, %34 : vector<2x128xf32>
    %c1_10 = arith.constant 1 : index
    %36 = memref.load %arg4[%c1_10] : memref<24xf32, #tpu.memory_space<smem>>
    %37 = vector.broadcast %36 : f32 to vector<2x128xf32>
    %38 = arith.mulf %16, %37 : vector<2x128xf32>
    %39 = arith.addf %35, %38 : vector<2x128xf32>
    %c2_11 = arith.constant 2 : index
    %40 = memref.load %arg4[%c2_11] : memref<24xf32, #tpu.memory_space<smem>>
    %41 = vector.broadcast %40 : f32 to vector<2x128xf32>
    %42 = arith.mulf %24, %41 : vector<2x128xf32>
    %43 = arith.addf %39, %42 : vector<2x128xf32>
    %c3_12 = arith.constant 3 : index
    %44 = memref.load %arg4[%c3_12] : memref<24xf32, #tpu.memory_space<smem>>
    %45 = vector.broadcast %44 : f32 to vector<2x128xf32>
    %46 = arith.mulf %32, %45 : vector<2x128xf32>
    %47 = arith.addf %43, %46 : vector<2x128xf32>
    %c0_13 = arith.constant 0 : index
    %48 = memref.load %arg6[%c0_13] : memref<6xf32, #tpu.memory_space<smem>>
    %49 = vector.broadcast %48 : f32 to vector<2x128xf32>
    %50 = arith.addf %47, %49 : vector<2x128xf32>
    %c0_14 = arith.constant 0 : index
    %51 = memref.load %arg7[%c0_14] : memref<6xf32, #tpu.memory_space<smem>>
    %52 = vector.broadcast %51 : f32 to vector<2x128xf32>
    %53 = arith.addf %50, %52 : vector<2x128xf32>
    %c0_15 = arith.constant 0 : index
    %c0_16 = arith.constant 0 : index
    %54 = vector.load %arg9[%c0_15, %c0_16] : memref<4x384xf32, #tpu.memory_space<vmem>>, vector<2x128xf32>
    tpu.vector_store %arg9[%c0_15, %c0_16], %53 {strides = array<i32>} : memref<4x384xf32, #tpu.memory_space<vmem>>, vector<2x128xf32>,
    %c4 = arith.constant 4 : index
    %55 = memref.load %arg4[%c4] : memref<24xf32, #tpu.memory_space<smem>>
    %56 = vector.broadcast %55 : f32 to vector<2x128xf32>
    %57 = arith.mulf %8, %56 : vector<2x128xf32>
    %c5 = arith.constant 5 : index
    %58 = memref.load %arg4[%c5] : memref<24xf32, #tpu.memory_space<smem>>
    %59 = vector.broadcast %58 : f32 to vector<2x128xf32>
    %60 = arith.mulf %16, %59 : vector<2x128xf32>
    %61 = arith.addf %57, %60 : vector<2x128xf32>
    %c6 = arith.constant 6 : index
    %62 = memref.load %arg4[%c6] : memref<24xf32, #tpu.memory_space<smem>>
    %63 = vector.broadcast %62 : f32 to vector<2x128xf32>
    %64 = arith.mulf %24, %63 : vector<2x128xf32>
    %65 = arith.addf %61, %64 : vector<2x128xf32>
    %c7 = arith.constant 7 : index
    %66 = memref.load %arg4[%c7] : memref<24xf32, #tpu.memory_space<smem>>
    %67 = vector.broadcast %66 : f32 to vector<2x128xf32>
    %68 = arith.mulf %32, %67 : vector<2x128xf32>
    %69 = arith.addf %65, %68 : vector<2x128xf32>
    %c1_17 = arith.constant 1 : index
    %70 = memref.load %arg6[%c1_17] : memref<6xf32, #tpu.memory_space<smem>>
    %71 = vector.broadcast %70 : f32 to vector<2x128xf32>
    %72 = arith.addf %69, %71 : vector<2x128xf32>
    %c1_18 = arith.constant 1 : index
    %73 = memref.load %arg7[%c1_18] : memref<6xf32, #tpu.memory_space<smem>>
    %74 = vector.broadcast %73 : f32 to vector<2x128xf32>
    %75 = arith.addf %72, %74 : vector<2x128xf32>
    %c0_19 = arith.constant 0 : index
    %c128 = arith.constant 128 : index
    %76 = vector.load %arg9[%c0_19, %c128] : memref<4x384xf32, #tpu.memory_space<vmem>>, vector<2x128xf32>
    tpu.vector_store %arg9[%c0_19, %c128], %75 {strides = array<i32>} : memref<4x384xf32, #tpu.memory_space<vmem>>, vector<2x128xf32>,
    %c8 = arith.constant 8 : index
    %77 = memref.load %arg4[%c8] : memref<24xf32, #tpu.memory_space<smem>>
    %78 = vector.broadcast %77 : f32 to vector<2x128xf32>
    %79 = arith.mulf %8, %78 : vector<2x128xf32>
    %c9 = arith.constant 9 : index
    %80 = memref.load %arg4[%c9] : memref<24xf32, #tpu.memory_space<smem>>
    %81 = vector.broadcast %80 : f32 to vector<2x128xf32>
    %82 = arith.mulf %16, %81 : vector<2x128xf32>
    %83 = arith.addf %79, %82 : vector<2x128xf32>
    %c10 = arith.constant 10 : index
    %84 = memref.load %arg4[%c10] : memref<24xf32, #tpu.memory_space<smem>>
    %85 = vector.broadcast %84 : f32 to vector<2x128xf32>
    %86 = arith.mulf %24, %85 : vector<2x128xf32>
    %87 = arith.addf %83, %86 : vector<2x128xf32>
    %c11 = arith.constant 11 : index
    %88 = memref.load %arg4[%c11] : memref<24xf32, #tpu.memory_space<smem>>
    %89 = vector.broadcast %88 : f32 to vector<2x128xf32>
    %90 = arith.mulf %32, %89 : vector<2x128xf32>
    %91 = arith.addf %87, %90 : vector<2x128xf32>
    %c2_20 = arith.constant 2 : index
    %92 = memref.load %arg6[%c2_20] : memref<6xf32, #tpu.memory_space<smem>>
    %93 = vector.broadcast %92 : f32 to vector<2x128xf32>
    %94 = arith.addf %91, %93 : vector<2x128xf32>
    %c0_21 = arith.constant 0 : index
    %c256 = arith.constant 256 : index
    %95 = vector.load %arg9[%c0_21, %c256] : memref<4x384xf32, #tpu.memory_space<vmem>>, vector<2x128xf32>
    tpu.vector_store %arg9[%c0_21, %c256], %94 {strides = array<i32>} : memref<4x384xf32, #tpu.memory_space<vmem>>, vector<2x128xf32>,
    %c12 = arith.constant 12 : index
    %96 = memref.load %arg4[%c12] : memref<24xf32, #tpu.memory_space<smem>>
    %97 = vector.broadcast %96 : f32 to vector<2x128xf32>
    %98 = arith.mulf %8, %97 : vector<2x128xf32>
    %c13 = arith.constant 13 : index
    %99 = memref.load %arg4[%c13] : memref<24xf32, #tpu.memory_space<smem>>
    %100 = vector.broadcast %99 : f32 to vector<2x128xf32>
    %101 = arith.mulf %16, %100 : vector<2x128xf32>
    %102 = arith.addf %98, %101 : vector<2x128xf32>
    %c14 = arith.constant 14 : index
    %103 = memref.load %arg4[%c14] : memref<24xf32, #tpu.memory_space<smem>>
    %104 = vector.broadcast %103 : f32 to vector<2x128xf32>
    %105 = arith.mulf %24, %104 : vector<2x128xf32>
    %106 = arith.addf %102, %105 : vector<2x128xf32>
    %c15 = arith.constant 15 : index
    %107 = memref.load %arg4[%c15] : memref<24xf32, #tpu.memory_space<smem>>
    %108 = vector.broadcast %107 : f32 to vector<2x128xf32>
    %109 = arith.mulf %32, %108 : vector<2x128xf32>
    %110 = arith.addf %106, %109 : vector<2x128xf32>
    %c3_22 = arith.constant 3 : index
    %111 = memref.load %arg6[%c3_22] : memref<6xf32, #tpu.memory_space<smem>>
    %112 = vector.broadcast %111 : f32 to vector<2x128xf32>
    %113 = arith.addf %110, %112 : vector<2x128xf32>
    %c3_23 = arith.constant 3 : index
    %114 = memref.load %arg7[%c3_23] : memref<6xf32, #tpu.memory_space<smem>>
    %115 = vector.broadcast %114 : f32 to vector<2x128xf32>
    %116 = arith.addf %113, %115 : vector<2x128xf32>
    %c2_24 = arith.constant 2 : index
    %c0_25 = arith.constant 0 : index
    %117 = vector.load %arg9[%c2_24, %c0_25] : memref<4x384xf32, #tpu.memory_space<vmem>>, vector<2x128xf32>
    tpu.vector_store %arg9[%c2_24, %c0_25], %116 {strides = array<i32>} : memref<4x384xf32, #tpu.memory_space<vmem>>, vector<2x128xf32>,
    %c16 = arith.constant 16 : index
    %118 = memref.load %arg4[%c16] : memref<24xf32, #tpu.memory_space<smem>>
    %119 = vector.broadcast %118 : f32 to vector<2x128xf32>
    %120 = arith.mulf %8, %119 : vector<2x128xf32>
    %c17 = arith.constant 17 : index
    %121 = memref.load %arg4[%c17] : memref<24xf32, #tpu.memory_space<smem>>
    %122 = vector.broadcast %121 : f32 to vector<2x128xf32>
    %123 = arith.mulf %16, %122 : vector<2x128xf32>
    %124 = arith.addf %120, %123 : vector<2x128xf32>
    %c18 = arith.constant 18 : index
    %125 = memref.load %arg4[%c18] : memref<24xf32, #tpu.memory_space<smem>>
    %126 = vector.broadcast %125 : f32 to vector<2x128xf32>
    %127 = arith.mulf %24, %126 : vector<2x128xf32>
    %128 = arith.addf %124, %127 : vector<2x128xf32>
    %c19 = arith.constant 19 : index
    %129 = memref.load %arg4[%c19] : memref<24xf32, #tpu.memory_space<smem>>
    %130 = vector.broadcast %129 : f32 to vector<2x128xf32>
    %131 = arith.mulf %32, %130 : vector<2x128xf32>
    %132 = arith.addf %128, %131 : vector<2x128xf32>
    %c4_26 = arith.constant 4 : index
    %133 = memref.load %arg6[%c4_26] : memref<6xf32, #tpu.memory_space<smem>>
    %134 = vector.broadcast %133 : f32 to vector<2x128xf32>
    %135 = arith.addf %132, %134 : vector<2x128xf32>
    %c4_27 = arith.constant 4 : index
    %136 = memref.load %arg7[%c4_27] : memref<6xf32, #tpu.memory_space<smem>>
    %137 = vector.broadcast %136 : f32 to vector<2x128xf32>
    %138 = arith.addf %135, %137 : vector<2x128xf32>
    %c2_28 = arith.constant 2 : index
    %c128_29 = arith.constant 128 : index
    %139 = vector.load %arg9[%c2_28, %c128_29] : memref<4x384xf32, #tpu.memory_space<vmem>>, vector<2x128xf32>
    tpu.vector_store %arg9[%c2_28, %c128_29], %138 {strides = array<i32>} : memref<4x384xf32, #tpu.memory_space<vmem>>, vector<2x128xf32>,
    %c20 = arith.constant 20 : index
    %140 = memref.load %arg4[%c20] : memref<24xf32, #tpu.memory_space<smem>>
    %141 = vector.broadcast %140 : f32 to vector<2x128xf32>
    %142 = arith.mulf %8, %141 : vector<2x128xf32>
    %c21 = arith.constant 21 : index
    %143 = memref.load %arg4[%c21] : memref<24xf32, #tpu.memory_space<smem>>
    %144 = vector.broadcast %143 : f32 to vector<2x128xf32>
    %145 = arith.mulf %16, %144 : vector<2x128xf32>
    %146 = arith.addf %142, %145 : vector<2x128xf32>
    %c22 = arith.constant 22 : index
    %147 = memref.load %arg4[%c22] : memref<24xf32, #tpu.memory_space<smem>>
    %148 = vector.broadcast %147 : f32 to vector<2x128xf32>
    %149 = arith.mulf %24, %148 : vector<2x128xf32>
    %150 = arith.addf %146, %149 : vector<2x128xf32>
    %c23 = arith.constant 23 : index
    %151 = memref.load %arg4[%c23] : memref<24xf32, #tpu.memory_space<smem>>
    %152 = vector.broadcast %151 : f32 to vector<2x128xf32>
    %153 = arith.mulf %32, %152 : vector<2x128xf32>
    %154 = arith.addf %150, %153 : vector<2x128xf32>
    %c5_30 = arith.constant 5 : index
    %155 = memref.load %arg6[%c5_30] : memref<6xf32, #tpu.memory_space<smem>>
    %156 = vector.broadcast %155 : f32 to vector<2x128xf32>
    %157 = arith.addf %154, %156 : vector<2x128xf32>
    %c2_31 = arith.constant 2 : index
    %c256_32 = arith.constant 256 : index
    %158 = vector.load %arg9[%c2_31, %c256_32] : memref<4x384xf32, #tpu.memory_space<vmem>>, vector<2x128xf32>
    tpu.vector_store %arg9[%c2_31, %c256_32], %157 {strides = array<i32>} : memref<4x384xf32, #tpu.memory_space<vmem>>, vector<2x128xf32>,
    %c0_33 = arith.constant 0 : index
    %159 = memref.load %arg5[%c0_33] : memref<6xf32, #tpu.memory_space<smem>>
    %c3_34 = arith.constant 3 : index
    %160 = memref.load %arg5[%c3_34] : memref<6xf32, #tpu.memory_space<smem>>
    %c1_35 = arith.constant 1 : index
    %161 = memref.load %arg5[%c1_35] : memref<6xf32, #tpu.memory_space<smem>>
    %c4_36 = arith.constant 4 : index
    %162 = memref.load %arg5[%c4_36] : memref<6xf32, #tpu.memory_space<smem>>
    %c2_37 = arith.constant 2 : index
    %163 = memref.load %arg5[%c2_37] : memref<6xf32, #tpu.memory_space<smem>>
    %c5_38 = arith.constant 5 : index
    %164 = memref.load %arg5[%c5_38] : memref<6xf32, #tpu.memory_space<smem>>
    %c2_39 = arith.constant 2 : index
    %165 = memref.load %arg7[%c2_39] : memref<6xf32, #tpu.memory_space<smem>>
    %c5_40 = arith.constant 5 : index
    %166 = memref.load %arg7[%c5_40] : memref<6xf32, #tpu.memory_space<smem>>
    %cst_41 = arith.constant 0.000000e+00 : f32
    %167 = vector.broadcast %cst_41 : f32 to vector<1x128xf32>
    %c0_i32 = arith.constant 0 : i32
    %c2_i32 = arith.constant 2 : i32
    %168 = arith.muli %c0_i32, %c2_i32 : i32
    %169 = tpu.assume_multiple %168, 2 : i32
    %c0_i32_42 = arith.constant 0 : i32
    %170 = arith.addi %169, %c0_i32_42 : i32
    %c1_i32 = arith.constant 1 : i32
    %171 = arith.subi %c1_i32, %169 : i32
    %c0_i32_43 = arith.constant 0 : i32
    %172 = arith.subi %171, %c0_i32_43 : i32
    %c0_i32_44 = arith.constant 0 : i32
    %173 = arith.addi %c0_i32_44, %170 : i32
    %174 = arith.index_cast %173 : i32 to index
    %c0_45 = arith.constant 0 : index
    %175 = vector.load %arg9[%174, %c0_45] : memref<4x384xf32, #tpu.memory_space<vmem>>, vector<1x384xf32>
    %176 = vector.extract_strided_slice %175 {offsets = [0, 0], sizes = [1, 128], strides = [1, 1]} : vector<1x384xf32> to vector<1x128xf32>
    %177 = vector.extract_strided_slice %175 {offsets = [0, 128], sizes = [1, 128], strides = [1, 1]} : vector<1x384xf32> to vector<1x128xf32>
    %178 = vector.extract_strided_slice %175 {offsets = [0, 256], sizes = [1, 128], strides = [1, 1]} : vector<1x384xf32> to vector<1x128xf32>
    %179 = vector.broadcast %159 : f32 to vector<1x128xf32>
    %180 = arith.mulf %167, %179 : vector<1x128xf32>
    %181 = arith.addf %176, %180 : vector<1x128xf32>
    %182 = arith.negf %181 : vector<1x128xf32>
    %183 = math.exp %182 : vector<1x128xf32>
    %cst_46 = arith.constant 1.000000e+00 : f32
    %184 = vector.broadcast %cst_46 : f32 to vector<1x128xf32>
    %185 = arith.addf %184, %183 : vector<1x128xf32>
    %186 = arith.divf %184, %185 : vector<1x128xf32>
    %187 = vector.broadcast %161 : f32 to vector<1x128xf32>
    %188 = arith.mulf %167, %187 : vector<1x128xf32>
    %189 = arith.addf %177, %188 : vector<1x128xf32>
    %190 = arith.negf %189 : vector<1x128xf32>
    %191 = math.exp %190 : vector<1x128xf32>
    %cst_47 = arith.constant 1.000000e+00 : f32
    %192 = vector.broadcast %cst_47 : f32 to vector<1x128xf32>
    %193 = arith.addf %192, %191 : vector<1x128xf32>
    %194 = arith.divf %192, %193 : vector<1x128xf32>
    %195 = vector.broadcast %163 : f32 to vector<1x128xf32>
    %196 = arith.mulf %167, %195 : vector<1x128xf32>
    %197 = vector.broadcast %165 : f32 to vector<1x128xf32>
    %198 = arith.addf %196, %197 : vector<1x128xf32>
    %199 = arith.mulf %186, %198 : vector<1x128xf32>
    %200 = arith.addf %178, %199 : vector<1x128xf32>
    %201 = math.tanh %200 : vector<1x128xf32>
    %202 = arith.subf %167, %201 : vector<1x128xf32>
    %203 = arith.mulf %194, %202 : vector<1x128xf32>
    %204 = arith.addf %201, %203 : vector<1x128xf32>
    %c2_i32_48 = arith.constant 2 : i32
    %205 = arith.addi %c2_i32_48, %172 : i32
    %206 = arith.index_cast %205 : i32 to index
    %c0_49 = arith.constant 0 : index
    %207 = vector.load %arg9[%206, %c0_49] : memref<4x384xf32, #tpu.memory_space<vmem>>, vector<1x384xf32>
    %208 = vector.extract_strided_slice %207 {offsets = [0, 0], sizes = [1, 128], strides = [1, 1]} : vector<1x384xf32> to vector<1x128xf32>
    %209 = vector.extract_strided_slice %207 {offsets = [0, 128], sizes = [1, 128], strides = [1, 1]} : vector<1x384xf32> to vector<1x128xf32>
    %210 = vector.extract_strided_slice %207 {offsets = [0, 256], sizes = [1, 128], strides = [1, 1]} : vector<1x384xf32> to vector<1x128xf32>
    %211 = vector.broadcast %160 : f32 to vector<1x128xf32>
    %212 = arith.mulf %167, %211 : vector<1x128xf32>
    %213 = arith.addf %208, %212 : vector<1x128xf32>
    %214 = arith.negf %213 : vector<1x128xf32>
    %215 = math.exp %214 : vector<1x128xf32>
    %cst_50 = arith.constant 1.000000e+00 : f32
    %216 = vector.broadcast %cst_50 : f32 to vector<1x128xf32>
    %217 = arith.addf %216, %215 : vector<1x128xf32>
    %218 = arith.divf %216, %217 : vector<1x128xf32>
    %219 = vector.broadcast %162 : f32 to vector<1x128xf32>
    %220 = arith.mulf %167, %219 : vector<1x128xf32>
    %221 = arith.addf %209, %220 : vector<1x128xf32>
    %222 = arith.negf %221 : vector<1x128xf32>
    %223 = math.exp %222 : vector<1x128xf32>
    %cst_51 = arith.constant 1.000000e+00 : f32
    %224 = vector.broadcast %cst_51 : f32 to vector<1x128xf32>
    %225 = arith.addf %224, %223 : vector<1x128xf32>
    %226 = arith.divf %224, %225 : vector<1x128xf32>
    %227 = vector.broadcast %164 : f32 to vector<1x128xf32>
    %228 = arith.mulf %167, %227 : vector<1x128xf32>
    %229 = vector.broadcast %166 : f32 to vector<1x128xf32>
    %230 = arith.addf %228, %229 : vector<1x128xf32>
    %231 = arith.mulf %218, %230 : vector<1x128xf32>
    %232 = arith.addf %210, %231 : vector<1x128xf32>
    %233 = math.tanh %232 : vector<1x128xf32>
    %234 = arith.subf %167, %233 : vector<1x128xf32>
    %235 = arith.mulf %226, %234 : vector<1x128xf32>
    %236 = arith.addf %233, %235 : vector<1x128xf32>
    %c1_i32_52 = arith.constant 1 : i32
    %237 = arith.addi %169, %c1_i32_52 : i32
    %c1_i32_53 = arith.constant 1 : i32
    %238 = arith.subi %c1_i32_53, %169 : i32
    %c1_i32_54 = arith.constant 1 : i32
    %239 = arith.subi %238, %c1_i32_54 : i32
    %c0_i32_55 = arith.constant 0 : i32
    %240 = arith.addi %c0_i32_55, %237 : i32
    %241 = arith.index_cast %240 : i32 to index
    %c0_56 = arith.constant 0 : index
    %242 = vector.load %arg9[%241, %c0_56] : memref<4x384xf32, #tpu.memory_space<vmem>>, vector<1x384xf32>
    %243 = vector.extract_strided_slice %242 {offsets = [0, 0], sizes = [1, 128], strides = [1, 1]} : vector<1x384xf32> to vector<1x128xf32>
    %244 = vector.extract_strided_slice %242 {offsets = [0, 128], sizes = [1, 128], strides = [1, 1]} : vector<1x384xf32> to vector<1x128xf32>
    %245 = vector.extract_strided_slice %242 {offsets = [0, 256], sizes = [1, 128], strides = [1, 1]} : vector<1x384xf32> to vector<1x128xf32>
    %246 = vector.broadcast %159 : f32 to vector<1x128xf32>
    %247 = arith.mulf %204, %246 : vector<1x128xf32>
    %248 = arith.addf %243, %247 : vector<1x128xf32>
    %249 = arith.negf %248 : vector<1x128xf32>
    %250 = math.exp %249 : vector<1x128xf32>
    %cst_57 = arith.constant 1.000000e+00 : f32
    %251 = vector.broadcast %cst_57 : f32 to vector<1x128xf32>
    %252 = arith.addf %251, %250 : vector<1x128xf32>
    %253 = arith.divf %251, %252 : vector<1x128xf32>
    %254 = vector.broadcast %161 : f32 to vector<1x128xf32>
    %255 = arith.mulf %204, %254 : vector<1x128xf32>
    %256 = arith.addf %244, %255 : vector<1x128xf32>
    %257 = arith.negf %256 : vector<1x128xf32>
    %258 = math.exp %257 : vector<1x128xf32>
    %cst_58 = arith.constant 1.000000e+00 : f32
    %259 = vector.broadcast %cst_58 : f32 to vector<1x128xf32>
    %260 = arith.addf %259, %258 : vector<1x128xf32>
    %261 = arith.divf %259, %260 : vector<1x128xf32>
    %262 = vector.broadcast %163 : f32 to vector<1x128xf32>
    %263 = arith.mulf %204, %262 : vector<1x128xf32>
    %264 = vector.broadcast %165 : f32 to vector<1x128xf32>
    %265 = arith.addf %263, %264 : vector<1x128xf32>
    %266 = arith.mulf %253, %265 : vector<1x128xf32>
    %267 = arith.addf %245, %266 : vector<1x128xf32>
    %268 = math.tanh %267 : vector<1x128xf32>
    %269 = arith.subf %204, %268 : vector<1x128xf32>
    %270 = arith.mulf %261, %269 : vector<1x128xf32>
    %271 = arith.addf %268, %270 : vector<1x128xf32>
    %c2_i32_59 = arith.constant 2 : i32
    %272 = arith.addi %c2_i32_59, %239 : i32
    %273 = arith.index_cast %272 : i32 to index
    %c0_60 = arith.constant 0 : index
    %274 = vector.load %arg9[%273, %c0_60] : memref<4x384xf32, #tpu.memory_space<vmem>>, vector<1x384xf32>
    %275 = vector.extract_strided_slice %274 {offsets = [0, 0], sizes = [1, 128], strides = [1, 1]} : vector<1x384xf32> to vector<1x128xf32>
    %276 = vector.extract_strided_slice %274 {offsets = [0, 128], sizes = [1, 128], strides = [1, 1]} : vector<1x384xf32> to vector<1x128xf32>
    %277 = vector.extract_strided_slice %274 {offsets = [0, 256], sizes = [1, 128], strides = [1, 1]} : vector<1x384xf32> to vector<1x128xf32>
    %278 = vector.broadcast %160 : f32 to vector<1x128xf32>
    %279 = arith.mulf %236, %278 : vector<1x128xf32>
    %280 = arith.addf %275, %279 : vector<1x128xf32>
    %281 = arith.negf %280 : vector<1x128xf32>
    %282 = math.exp %281 : vector<1x128xf32>
    %cst_61 = arith.constant 1.000000e+00 : f32
    %283 = vector.broadcast %cst_61 : f32 to vector<1x128xf32>
    %284 = arith.addf %283, %282 : vector<1x128xf32>
    %285 = arith.divf %283, %284 : vector<1x128xf32>
    %286 = vector.broadcast %162 : f32 to vector<1x128xf32>
    %287 = arith.mulf %236, %286 : vector<1x128xf32>
    %288 = arith.addf %276, %287 : vector<1x128xf32>
    %289 = arith.negf %288 : vector<1x128xf32>
    %290 = math.exp %289 : vector<1x128xf32>
    %cst_62 = arith.constant 1.000000e+00 : f32
    %291 = vector.broadcast %cst_62 : f32 to vector<1x128xf32>
    %292 = arith.addf %291, %290 : vector<1x128xf32>
    %293 = arith.divf %291, %292 : vector<1x128xf32>
    %294 = vector.broadcast %164 : f32 to vector<1x128xf32>
    %295 = arith.mulf %236, %294 : vector<1x128xf32>
    %296 = vector.broadcast %166 : f32 to vector<1x128xf32>
    %297 = arith.addf %295, %296 : vector<1x128xf32>
    %298 = arith.mulf %285, %297 : vector<1x128xf32>
    %299 = arith.addf %277, %298 : vector<1x128xf32>
    %300 = math.tanh %299 : vector<1x128xf32>
    %301 = arith.subf %236, %300 : vector<1x128xf32>
    %302 = arith.mulf %293, %301 : vector<1x128xf32>
    %303 = arith.addf %300, %302 : vector<1x128xf32>
    %304 = tpu.concatenate %204, %271 in 0 : vector<1x128xf32>, vector<1x128xf32> -> vector<2x128xf32>
    %305 = arith.index_cast %169 : i32 to index
    %c0_63 = arith.constant 0 : index
    %306 = vector.load %arg8[%305, %c0_63] : memref<4x128xf32, #tpu.memory_space<vmem>>, vector<2x128xf32>
    tpu.vector_store %arg8[%305, %c0_63], %304 {strides = array<i32>} : memref<4x128xf32, #tpu.memory_space<vmem>>, vector<2x128xf32>,
    %c1_i32_64 = arith.constant 1 : i32
    %307 = arith.addi %c0_i32, %c1_i32_64 : i32
    %c2_i32_65 = arith.constant 2 : i32
    %308 = arith.muli %307, %c2_i32_65 : i32
    %c4_i32 = arith.constant 4 : i32
    %309 = arith.subi %c4_i32, %308 : i32
    %310 = tpu.assume_multiple %309, 2 : i32
    %311 = tpu.concatenate %303, %236 in 0 : vector<1x128xf32>, vector<1x128xf32> -> vector<2x128xf32>
    %312 = arith.index_cast %310 : i32 to index
    %c0_66 = arith.constant 0 : index
    %313 = vector.load %arg8[%312, %c0_66] : memref<4x128xf32, #tpu.memory_space<vmem>>, vector<2x128xf32>
    tpu.vector_store %arg8[%312, %c0_66], %311 {strides = array<i32>} : memref<4x128xf32, #tpu.memory_space<vmem>>, vector<2x128xf32>,
    %c1_i32_67 = arith.constant 1 : i32
    return
  }
  func.func @transform_0(%arg0: i32) -> (i32, i32) {
    %c0_i32 = arith.constant 0 : i32
    %c0_i32_0 = arith.constant 0 : i32
    return %c0_i32, %arg0 : i32, i32
  }
  func.func @transform_1(%arg0: i32) -> i32 {
    %c0_i32 = arith.constant 0 : i32
    %c0_i32_0 = arith.constant 0 : i32
    return %c0_i32 : i32
  }
  func.func @transform_2(%arg0: i32) -> i32 {
    %c0_i32 = arith.constant 0 : i32
    %c0_i32_0 = arith.constant 0 : i32
    return %c0_i32 : i32
  }
  func.func @transform_3(%arg0: i32) -> i32 {
    %c0_i32 = arith.constant 0 : i32
    %c0_i32_0 = arith.constant 0 : i32
    return %c0_i32 : i32
  }
  func.func @transform_4(%arg0: i32) -> i32 {
    %c0_i32 = arith.constant 0 : i32
    %c0_i32_0 = arith.constant 0 : i32
    return %c0_i32 : i32
  }
  func.func @transform_5(%arg0: i32) -> i32 {
    %c0_i32 = arith.constant 0 : i32
    %c0_i32_0 = arith.constant 0 : i32
    return %c0_i32 : i32
  }
  func.func @transform_6(%arg0: i32) -> i32 {
    %c0_i32 = arith.constant 0 : i32
    %c0_i32_0 = arith.constant 0 : i32
    return %c0_i32 : i32
  }
  func.func @transform_7(%arg0: i32) -> (i32, i32) {
    %c0_i32 = arith.constant 0 : i32
    %c0_i32_0 = arith.constant 0 : i32
    return %c0_i32, %arg0 : i32, i32
  }
}

</mosaic_0001>

<bundles_post_ra>
// kernel: tpu_custom_call.1
= control target key start
LH: loop header
LB: loop body
LE: loop exit
PB: predicated region body
PF: predicated region fallthrough
CT: control target
= control target key end

     0   :  { %12 = vsyncpa [#allocation4], 0  ;;  %s900_s0 = inlined_call_operand.hbm [shape: f32[2,128], index: 0, kind: input, shape index: {}]   ;;  %s901_s1 = inlined_call_operand.vmem [shape: f32[4], index: 1, kind: input, shape index: {}]   ;;  %s902_s2 = inlined_call_operand.vmem [shape: f32[4], index: 2, kind: input, shape index: {}]   ;;  %s903_s3 = inlined_call_operand.vmem [shape: f32[24], index: 3, kind: input, shape index: {}]   ;;  %s904_s4 = inlined_call_operand.vmem [shape: f32[6], index: 4, kind: input, shape index: {}]   ;;  %s905_s5 = inlined_call_operand.vmem [shape: f32[6], index: 5, kind: input, shape index: {}]   ;;  %s906_s6 = inlined_call_operand.vmem [shape: f32[6], index: 6, kind: input, shape index: {}]   ;;  %s907_s7 = inlined_call_operand.hbm [shape: f32[4,128], index: 7, kind: output, shape index: {}]  }
   0x1   :  { %13 = vsyncpa [#allocation6], 0 }
   0x2   :  { %14 = vsyncpa [#allocation9], 0 }
   0x3   :  { %15 = vsyncpa [#allocation12], 0 }
   0x4   :  { %16 = vsyncpa [#allocation15], 0  ;;  %s44_s26 = sshll.u32 %s902_s2, 4  ;;  %s45_s26 = int_to_ptr.vmem [resolvable:$true] %s44_s26 }
   0x5   :  { %17 = vsyncpa [#allocation5], 0  ;;  %s64_s29 = sshll.u32 %s904_s4, 4  ;;  %s587_s30 = scalar_lea.vmem %s45_s26, 16  ;;  %s65_s29 = int_to_ptr.vmem [resolvable:$true] %s64_s29 }
   0x6   :  { %p588_p0 = scmp.ne.s32.totalorder %s45_s26, %s587_s30  ;;  %p592_p1 = scmp.lt.s32.totalorder %s45_s26, %s45_s26 }
   0x7   :  { %p593_p2 = scmp.lt.s32.totalorder %s587_s30, %s587_s30 }
   0x9   :  { %p594_p3 = por %p593_p2, %p592_p1 }
   0xb   :  { %p595_p4 = pnand %p594_p3, %p588_p0 }
   0xd   :  { %598 = shalt.err (!%p595_p4)
}
   0xe   :  { %s711_s8 = smov [#allocation8]   ;;  %s599_s9 = scalar_lea.vmem %s65_s29, 16 }
   0xf   :  { %47 = dma.vmem_to_smem %s45_s26, 16, %s711_s8, [#allocation9]  }
  0x10   :  { %p600_p5 = scmp.ne.s32.totalorder %s65_s29, %s599_s9  ;;  %p604_p6 = scmp.lt.s32.totalorder %s65_s29, %s65_s29 }
  0x11   :  { %p605_p7 = scmp.lt.s32.totalorder %s599_s9, %s599_s9 }
  0x13   :  { %p606_p8 = por %p605_p7, %p604_p6 }
  0x15   :  { %p607_p9 = pnand %p606_p8, %p600_p5 }
  0x17   :  { %610 = shalt.err (!%p607_p9)
}
  0x18   :  { %s712_s2 = smov [#allocation11]   ;;  %s34_s11 = sshll.u32 %s901_s1, 4  ;;  %s35_s11 = int_to_ptr.vmem [resolvable:$true] %s34_s11 }
  0x19   :  { %67 = dma.vmem_to_smem %s65_s29, 16, %s712_s2, [#allocation12]  }
  0x1a   :  { %s713_s12 = smov [#allocation3]  }
  0x1b   :  { %s24_s13 = sshll.u32 %s713_s12, 4  ;;  %s25_s13 = int_to_ptr.vmem [resolvable:$true] %s24_s13 }
  0x1c   :  { %s619_s14 = scalar_lea.vmem %s25_s13, 32  ;;  %p624_p11 = scmp.lt.s32.totalorder %s25_s13, %s25_s13 }
  0x1d   :  { %p620_p10 = scmp.ne.s32.totalorder %s25_s13, %s619_s14  ;;  %p625_p12 = scmp.lt.s32.totalorder %s619_s14, %s619_s14 }
  0x1f   :  { %p626_p13 = por %p625_p12, %p624_p11 }
  0x21   :  { %p627_p0 = pnand %p626_p13, %p620_p10 }
  0x23   :  { %630 = shalt.err (!%p627_p0)
}
  0x24   :  { %27 = dma.hbm_to_vmem [thread:$0]  %s900_s0, 32, %s25_s13, [#allocation4]  }
  0x25   :  { %s631_s17 = scalar_lea.vmem %s35_s11, 16  ;;  %p636_p2 = scmp.lt.s32.totalorder %s35_s11, %s35_s11 }
  0x26   :  { %p632_p1 = scmp.ne.s32.totalorder %s35_s11, %s631_s17  ;;  %p637_p3 = scmp.lt.s32.totalorder %s631_s17, %s631_s17 }
  0x28   :  { %p638_p4 = por %p637_p3, %p636_p2 }
  0x2a   :  { %p639_p5 = pnand %p638_p4, %p632_p1 }
  0x2c   :  { %642 = shalt.err (!%p639_p5)
}
  0x2d   :  { %s714_s1 = smov [#allocation7]   ;;  %s54_s20 = sshll.u32 %s903_s3, 4  ;;  %s55_s20 = int_to_ptr.vmem [resolvable:$true] %s54_s20 }
  0x2e   :  { %37 = dma.vmem_to_smem %s35_s11, 16, %s714_s1, [#allocation6]  }
  0x2f   :  { %s74_s23 = sshll.u32 %s905_s5, 4  ;;  %s643_s24 = scalar_lea.vmem %s55_s20, 16  ;;  %s75_s23 = int_to_ptr.vmem [resolvable:$true] %s74_s23 }
  0x30   :  { %p644_p6 = scmp.ne.s32.totalorder %s55_s20, %s643_s24  ;;  %p648_p7 = scmp.lt.s32.totalorder %s55_s20, %s55_s20 }
  0x31   :  { %p649_p8 = scmp.lt.s32.totalorder %s643_s24, %s643_s24 }
  0x33   :  { %p650_p9 = por %p649_p8, %p648_p7 }
  0x35   :  { %p651_p10 = pnand %p650_p9, %p644_p6 }
  0x37   :  { %654 = shalt.err (!%p651_p10)
}
  0x38   :  { %s715_s0 = smov [#allocation10]   ;;  %s655_s25 = scalar_lea.vmem %s75_s23, 16 }
  0x39   :  { %57 = dma.vmem_to_smem %s55_s20, 16, %s715_s0, [#allocation9]  }
  0x3a   :  { %p656_p11 = scmp.ne.s32.totalorder %s75_s23, %s655_s25  ;;  %p660_p12 = scmp.lt.s32.totalorder %s75_s23, %s75_s23 }
  0x3b   :  { %p661_p13 = scmp.lt.s32.totalorder %s655_s25, %s655_s25 }
  0x3d   :  { %p662_p0 = por %p661_p13, %p660_p12 }
  0x3f   :  { %p663_p1 = pnand %p662_p0, %p656_p11 }
  0x41   :  { %666 = shalt.err (!%p663_p1)
}
  0x42   :  { %s716_s3 = smov [#allocation13]   ;;  %s84_s27 = sshll.u32 %s906_s6, 4  ;;  %s85_s27 = int_to_ptr.vmem [resolvable:$true] %s84_s27 }
  0x43   :  { %77 = dma.vmem_to_smem %s75_s23, 16, %s716_s3, [#allocation12]  }
  0x44   :  { %s667_s28 = scalar_lea.vmem %s85_s27, 16  ;;  %p672_p3 = scmp.lt.s32.totalorder %s85_s27, %s85_s27 }
  0x45   :  { %p668_p2 = scmp.ne.s32.totalorder %s85_s27, %s667_s28  ;;  %p673_p4 = scmp.lt.s32.totalorder %s667_s28, %s667_s28 }
  0x47   :  { %p674_p5 = por %p673_p4, %p672_p3 }
  0x49   :  { %p675_p6 = pnand %p674_p5, %p668_p2 }
  0x4b   :  { %678 = shalt.err (!%p675_p6)
}
  0x4c   :  { %s717_s29 = smov [#allocation14]  }
  0x4d   :  { %87 = dma.vmem_to_smem %s85_s27, 16, %s717_s29, [#allocation15]  }
  0x4e   :  { %699 = dma.done.wait [#allocation4], 32  }
  0x4f   :  { %700 = vsyncadd [#allocation4], 4294967264 }
  0x50   :  { %701 = dma.done.wait [#allocation6], 16  }
  0x51   :  { %702 = vsyncadd [#allocation6], 4294967280 }
  0x52   :  { %703 = dma.done.wait [#allocation9], 32  }
  0x53   :  { %704 = vsyncadd [#allocation9], 4294967264 }
  0x54   :  { %705 = dma.done.wait [#allocation12], 32  }
  0x55   :  { %706 = vsyncadd [#allocation12], 4294967264 }
  0x56   :  { %707 = dma.done.wait [#allocation15], 16  }
  0x57   :  { %708 = vsyncadd [#allocation15], 4294967280 }
  0x58   :  { %109 = sfence }
  0x59   :  { %s111_s6 = sld [smem:[#allocation7]]  ;;  %v110_v0 = vld [vmem:[#allocation3] sm:$0x3]  ;;  %vm447_vm0 = vcmask 1040384  }
  0x5a   :  { %s114_s30 = sld [smem:[#allocation8]] }
  0x5b   :  { %s487_s8 = sld [smem:[#allocation7 + $0x1]] }
  0x5c   :  { %s488_s9 = sld [smem:[#allocation8 + $0x1]] }
  0x5d   :  { %s489_s2 = sld [smem:[#allocation7 + $0x2]] }
  0x5e   :  { %s490_s4 = sld [smem:[#allocation8 + $0x2]] }
  0x5f   :  { %v112_v1 = vstv %s111_s6  ;;  %s491_s10 = sld [smem:[#allocation7 + $0x3]] }
  0x60   :  { %v113_v2 = vmul.f32 %v112_v1, %v110_v0  ;;  %v115_v3 = vstv %s114_s30  ;;  %s492_s11 = sld [smem:[#allocation8 + $0x3]] }
  0x61   :  { %v119_v4 = vstv %s487_s8  ;;  %s139_s12 = sld [smem:[#allocation10]] }
  0x62   :  { %v116_v5 = vadd.f32 %v115_v3, %v113_v2  ;;  %v120_v6 = vmul.f32 %v119_v4, %v110_v0  ;;  %v122_v7 = vstv %s488_s9  ;;  %s493_s13 = sld [smem:[#allocation10 + $0x1]] }
  0x63   :  { %v126_v8 = vstv %s489_s2  ;;  %s494_s14 = sld [smem:[#allocation10 + $0x2]] }
  0x64   :  { %v780_v9 = vmax.f32 %v116_v5, 0.0  ;;  %v123_v10 = vadd.f32 %v122_v7, %v120_v6  ;;  %v127_v11 = vmul.f32 %v126_v8, %v110_v0  ;;  %v129_v12 = vstv %s490_s4  ;;  %s495_s15 = sld [smem:[#allocation10 + $0x3]] }
  0x65   :  { %v133_v13 = vstv %s491_s10  ;;  %s782_s16 = sld [smem:[#allocation13]] }
  0x66   :  { %v784_v14 = vmax.f32 %v123_v10, 0.0  ;;  %v130_v15 = vadd.f32 %v129_v12, %v127_v11  ;;  %v134_v16 = vmul.f32 %v133_v13, %v110_v0  ;;  %v136_v17 = vstv %s492_s11  ;;  %s786_s17 = sld [smem:[#allocation14]] }
  0x67   :  { %v140_v18 = vstv %s139_s12  ;;  %s496_s1 = sld [smem:[#allocation10 + $0x4]] }
  0x68   :  { %v788_v19 = vmax.f32 %v130_v15, 0.0  ;;  %v137_v20 = vadd.f32 %v136_v17, %v134_v16  ;;  %v141_v21 = vmul.f32 %v140_v18, %v780_v9  ;;  %v143_v22 = vstv %s493_s13  ;;  %s497_s18 = sld [smem:[#allocation10 + $0x5]] }
  0x69   :  { %v144_v23 = vmul.f32 %v143_v22, %v784_v14  ;;  %v147_v24 = vstv %s494_s14  ;;  %s498_s19 = sld [smem:[#allocation10 + $0x6]] }
  0x6a   :  { %v792_v25 = vmax.f32 %v137_v20, 0.0  ;;  %v148_v26 = vmul.f32 %v147_v24, %v788_v19  ;;  %v151_v27 = vstv %s495_s15  ;;  %s499_s20 = sld [smem:[#allocation10 + $0x7]] }
  0x6b   :  { %v145_v28 = vadd.f32 %v144_v23, %v141_v21  ;;  %s795_s21 = sld [smem:[#allocation13 + $0x1]]  ;;  %v155_v32 = vstv %s782_s16 }
  0x6c   :  { %v152_v29 = vmul.f32 %v151_v27, %v792_v25  ;;  %s798_s22 = sld [smem:[#allocation14 + $0x1]]  ;;  %v158_v38 = vstv %s786_s17 }
  0x6d   :  { %v149_v30 = vadd.f32 %v148_v26, %v145_v28  ;;  %v162_v31 = vstv %s496_s1  ;;  %s502_s23 = sld [smem:[#allocation10 + $0x8]] }
  0x6e   :  { %v163_v33 = vmul.f32 %v162_v31, %v780_v9  ;;  %v165_v34 = vstv %s497_s18  ;;  %s503_s24 = sld [smem:[#allocation10 + $0x9]] }
  0x6f   :  { %v153_v35 = vadd.f32 %v152_v29, %v149_v30  ;;  %v166_v36 = vmul.f32 %v165_v34, %v784_v14  ;;  %v169_v37 = vstv %s498_s19  ;;  %s504_s0 = sld [smem:[#allocation10 + $0xa]] }
  0x70   :  { %v170_v39 = vmul.f32 %v169_v37, %v788_v19  ;;  %v173_v40 = vstv %s499_s20  ;;  %s505_s25 = sld [smem:[#allocation10 + $0xb]] }
  0x71   :  { %v156_v41 = vadd.f32 %v155_v32, %v153_v35  ;;  %v167_v42 = vadd.f32 %v166_v36, %v163_v33  ;;  %v174_v43 = vmul.f32 %v173_v40, %v792_v25  ;;  %s806_s3 = sld [smem:[#allocation13 + $0x2]]  ;;  %v177_v47 = vstv %s795_s21 }
  0x72   :  { %s507_s5 = sld [smem:[#allocation10 + $0xc]]  ;;  %v180_v53 = vstv %s798_s22 }
  0x73   :  { %v159_v44 = vadd.f32 %v158_v38, %v156_v41  ;;  %v171_v45 = vadd.f32 %v170_v39, %v167_v42  ;;  %v184_v46 = vstv %s502_s23  ;;  %s508_s26 = sld [smem:[#allocation10 + $0xd]]  ;;  %s718_s23 = smov [#allocation16]  }
  0x74   :  { %v185_v48 = vmul.f32 %v184_v46, %v780_v9  ;;  %v187_v49 = vstv %s503_s24  ;;  %s509_s27 = sld [smem:[#allocation10 + $0xe]]  ;;  %s465_s24 = sshll.u32 %s718_s23, 4  ;;  %s466_s24 = int_to_ptr.vmem [resolvable:$true] %s465_s24 }
  0x75   :  { %160 = vst [vmem:[#allocation2] sm:$0x3] %v159_v44  ;;  %v175_v50 = vadd.f32 %v174_v43, %v171_v45  ;;  %v188_v51 = vmul.f32 %v187_v49, %v784_v14  ;;  %v191_v52 = vstv %s504_s0  ;;  %s510_s28 = sld [smem:[#allocation10 + $0xf]]  ;;  %s679_s0 = scalar_lea.vmem %s466_s24, 64 }
  0x76   :  { %v192_v54 = vmul.f32 %v191_v52, %v788_v19  ;;  %v195_v55 = vstv %s505_s25  ;;  %s813_s29 = sld [smem:[#allocation13 + $0x3]]  ;;  %p680_p7 = scmp.ne.s32.totalorder %s466_s24, %s679_s0 }
  0x77   :  { %v178_v56 = vadd.f32 %v177_v47, %v175_v50  ;;  %v189_v57 = vadd.f32 %v188_v51, %v185_v48  ;;  %v196_v58 = vmul.f32 %v195_v55, %v792_v25  ;;  %s816_s6 = sld [smem:[#allocation14 + $0x3]]  ;;  %v199_v0 = vstv %s806_s3  ;;  %p684_p8 = scmp.lt.s32.totalorder %s466_s24, %s466_s24 }
  0x78   :  { %v203_v59 = vstv %s507_s5  ;;  %s513_s30 = sld [smem:[#allocation10 + $0x10]]  ;;  %p685_p9 = scmp.lt.s32.totalorder %s679_s0, %s679_s0 }
  0x79   :  { %v181_v60 = vadd.f32 %v180_v53, %v178_v56  ;;  %v193_v61 = vadd.f32 %v192_v54, %v189_v57  ;;  %v204_v62 = vmul.f32 %v203_v59, %v780_v9  ;;  %v206_v63 = vstv %s508_s26  ;;  %s514_s8 = sld [smem:[#allocation10 + $0x11]] }
  0x7a   :  { %v207_v1 = vmul.f32 %v206_v63, %v784_v14  ;;  %v210_v2 = vstv %s509_s27  ;;  %s515_s9 = sld [smem:[#allocation10 + $0x12]]  ;;  %p686_p10 = por %p685_p9, %p684_p8 }
  0x7b   :  { %182 = vst [vmem:[#allocation2 + $0x4] sm:$0x3] %v181_v60  ;;  %v197_v3 = vadd.f32 %v196_v58, %v193_v61  ;;  %v211_v4 = vmul.f32 %v210_v2, %v788_v19  ;;  %v214_v5 = vstv %s510_s28  ;;  %s516_s2 = sld [smem:[#allocation10 + $0x13]] }
  0x7c   :  { %v208_v6 = vadd.f32 %v207_v1, %v204_v62  ;;  %v215_v7 = vmul.f32 %v214_v5, %v792_v25  ;;  %s823_s4 = sld [smem:[#allocation13 + $0x4]]  ;;  %v218_v12 = vstv %s813_s29  ;;  %p687_p11 = pnand %p686_p10, %p680_p7 }
  0x7d   :  { %v200_v8 = vadd.f32 %v199_v0, %v197_v3  ;;  %s825_s10 = sld [smem:[#allocation14 + $0x4]]  ;;  %v221_v20 = vstv %s816_s6 }
  0x7e   :  { %v212_v10 = vadd.f32 %v211_v4, %v208_v6  ;;  %v228_v11 = vstv %s513_s30  ;;  %s519_s11 = sld [smem:[#allocation10 + $0x14]] }
  0x7f   :  { %201 = vst [vmem:[#allocation2 + $0x8] sm:$0x3] %v200_v8  ;;  %v229_v13 = vmul.f32 %v228_v11, %v780_v9  ;;  %v231_v15 = vstv %s514_s8  ;;  %s520_s12 = sld [smem:[#allocation10 + $0x15]] }
  0x80   :  { %v216_v16 = vadd.f32 %v215_v7, %v212_v10  ;;  %v232_v17 = vmul.f32 %v231_v15, %v784_v14  ;;  %v235_v18 = vstv %s515_s9  ;;  %s521_s13 = sld [smem:[#allocation10 + $0x16]] }
  0x81   :  { %v236_v21 = vmul.f32 %v235_v18, %v788_v19  ;;  %v239_v22 = vstv %s516_s2  ;;  %s522_s14 = sld [smem:[#allocation10 + $0x17]] }
  0x82   :  { %v219_v23 = vadd.f32 %v218_v12, %v216_v16  ;;  %v233_v24 = vadd.f32 %v232_v17, %v229_v13  ;;  %v240_v26 = vmul.f32 %v239_v22, %v792_v25  ;;  %s833_s15 = sld [smem:[#allocation13 + $0x5]]  ;;  %v243_v30 = vstv %s823_s4 }
  0x83   :  { %s835_s16 = sld [smem:[#allocation11]]  ;;  %v246_v37 = vstv %s825_s10 }
  0x84   :  { %v222_v27 = vadd.f32 %v221_v20, %v219_v23  ;;  %v237_v28 = vadd.f32 %v236_v21, %v233_v24  ;;  %v253_v29 = vstv %s519_s11  ;;  %s843_s17 = sld [smem:[#allocation11 + $0x1]] }
  0x85   :  { %v254_v31 = vmul.f32 %v253_v29, %v780_v9  ;;  %v256_v32 = vstv %s520_s12  ;;  %s849_s1 = sld [smem:[#allocation11 + $0x3]] }
  0x86   :  { %v224_v33 = vrot.slane %v222_v27, 6  ;;  %v241_v34 = vadd.f32 %v240_v26, %v237_v28  ;;  %v257_v35 = vmul.f32 %v256_v32, %v784_v14  ;;  %v260_v36 = vstv %s521_s13  ;;  %v286_v9 = vld [vmem:[#allocation2] ss:$4 sm:$0x7]  ;;  %s855_s18 = sld [smem:[#allocation11 + $0x4]] }
  0x87   :  { %v261_v38 = vmul.f32 %v260_v36, %v788_v19  ;;  %v264_v39 = vstv %s522_s14  ;;  %v299_v53 = vrot.slane %v286_v9, 1  ;;  %s859_s19 = sld [smem:[#allocation11 + $0x2]]  ;;  %v313_v15 = vrot.slane %v286_v9, 2  ;;  %v372_v36 = vld [vmem:[#allocation2 + $0x1] ss:$4 sm:$0x7] }
  0x88   :  { %226 = vst [vmem:[#allocation2] sm:$0xc] %v224_v33  ;;  %v244_v40 = vadd.f32 %v243_v30, %v241_v34  ;;  %v258_v41 = vadd.f32 %v257_v35, %v254_v31  ;;  %v265_v42 = vmul.f32 %v264_v39, %v792_v25  ;;  %v268_v46 = vstv %s833_s15  ;;  %s862_s20 = sld [smem:[#allocation14 + $0x2]] }
  0x89   :  { %v287_v43 = vstv %s835_s16  ;;  %s870_s21 = sld [smem:[#allocation11 + $0x5]] }
  0x8a   :  { %v247_v44 = vadd.f32 %v246_v37, %v244_v40  ;;  %v262_v45 = vadd.f32 %v261_v38, %v258_v41  ;;  %v288_v14 = vmul.f32 0.0, %v287_v43  ;;  %v296_v51 = vstv %s843_s17  ;;  %s874_s22 = sld [smem:[#allocation14 + $0x5]] }
  0x8b   :  { %v297_v52 = vmul.f32 0.0, %v296_v51  ;;  %v330_v54 = vstv %s849_s1 }
  0x8c   :  { %v249_v19 = vrot.slane %v247_v44, 6  ;;  %v266_v47 = vadd.f32 %v265_v42, %v262_v45  ;;  %v289_v48 = vadd.f32 %v288_v14, %v286_v9  ;;  %v331_v55 = vmul.f32 0.0, %v330_v54 }
  0x8d   :  { %v301_v56 = vadd.f32 %v299_v53, %v297_v52  ;;  %v339_v63 = vstv %s855_s18  ;;  %v308_v2 = vstv %s859_s19  ;;  %v383_v44 = vrot.slane %v372_v36, 1 }
  0x8e   :  { %251 = vst [vmem:[#allocation2 + $0x4] sm:$0xc] %v249_v19  ;;  %v269_v25 = vadd.f32 %v268_v46, %v266_v47  ;;  %v531_v49 = vmul.f32 -1.442695, %v289_v48  ;;  %v340_v0 = vmul.f32 0.0, %v339_v63  ;;  %v309_v4 = vmul.f32 0.0, %v308_v2 }
  0x8f   :  { %v532_v59 = vmul.f32 -1.442695, %v301_v56  ;;  %v310_v5 = vstv %s862_s20  ;;  %v351_v18 = vstv %s870_s21 }
  0x90   :  { %v271_v50 = vrot.slane %v269_v25, 6  ;;  %547 = vpow2.f32 %v531_v49  ;;  %v311_v7 = vadd.f32 %v310_v5, %v309_v4  ;;  %v352_v20 = vmul.f32 0.0, %v351_v18 }
  0x91   :  { %v353_v21 = vstv %s874_s22 }
  0x92   :  { %273 = vst [vmem:[#allocation2 + $0x8] sm:$0xc] %v271_v50  ;;  %v354_v22 = vadd.f32 %v353_v21, %v352_v20 }
  0x99   :  { %v329_v57 = vld [vmem:[#allocation2 + $0x3] ss:$4 sm:$0x7]  ;;  %v411_v19 = vld [vmem:[#allocation2 + $0x2] ss:$4 sm:$0x7] }
  0x9a   :  { %v332_v58 = vadd.f32 %v331_v55, %v329_v57  ;;  %v342_v1 = vrot.slane %v329_v57, 1  ;;  %v356_v27 = vrot.slane %v329_v57, 2 }
  0x9c   :  { %v533_v60 = vmul.f32 -1.442695, %v332_v58  ;;  %v344_v3 = vadd.f32 %v342_v1, %v340_v0 }
  0x9d   :  { %v548_v61 = vpop.eup %547 }
  0x9e   :  { %v293_v62 = vadd.f32 1.0, %v548_v61  ;;  %549 = vpow2.f32 %v533_v60  ;;  %v534_v6 = vmul.f32 -1.442695, %v344_v3  ;;  %v395_v61 = vrot.slane %v372_v36, 2 }
  0x9f   :  { %551 = vpow2.f32 %v532_v59 }
  0xa0   :  { %553 = vrcp.f32 %v293_v62 }
  0xa1   :  { %555 = vpow2.f32 %v534_v6 }
  0xab   :  { %v550_v8 = vpop.eup %549 }
  0xac   :  { %v552_v10 = vpop.eup %551  ;;  %v336_v11 = vadd.f32 1.0, %v550_v8 }
  0xad   :  { %v554_v12 = vpop.eup %553  ;;  %v305_v16 = vadd.f32 1.0, %v552_v10 }
  0xae   :  { %v312_v13 = vmul.f32 %v554_v12, %v311_v7  ;;  %557 = vrcp.f32 %v336_v11  ;;  %v556_v23 = vpop.eup %555  ;;  %v434_v7 = vrot.slane %v411_v19, 2 }
  0xaf   :  { %v348_v28 = vadd.f32 1.0, %v556_v23 }
  0xb0   :  { %v315_v17 = vadd.f32 %v313_v15, %v312_v13 }
  0xb2   :  { %559 = vtanh.f32 %v315_v17 }
  0xb3   :  { %561 = vrcp.f32 %v305_v16 }
  0xbb   :  { %v558_v24 = vpop.eup %557 }
  0xbc   :  { %v355_v26 = vmul.f32 %v558_v24, %v354_v22 }
  0xbe   :  { %v358_v29 = vadd.f32 %v356_v27, %v355_v26 }
  0xbf   :  { %v560_v30 = vpop.eup %559 }
  0xc0   :  { %v317_v31 = vsub.f32 0.0, %v560_v30  ;;  %563 = vtanh.f32 %v358_v29  ;;  %v562_v32 = vpop.eup %561 }
  0xc1   :  { %565 = vrcp.f32 %v348_v28 }
  0xc2   :  { %v318_v33 = vmul.f32 %v562_v32, %v317_v31 }
  0xc4   :  { %v878_v34 = vadd.f32 %v560_v30, %v318_v33 }
  0xc6   :  { %v373_v35 = vmul.f32 %v878_v34, %v287_v43  ;;  %v381_v42 = vmul.f32 %v878_v34, %v296_v51  ;;  %v422_v51 = vrot.slane %v411_v19, 1  ;;  %v392_v53 = vmul.f32 %v878_v34, %v308_v2 }
  0xc7   :  { %v442_v2 = vlaneseq }
  0xc8   :  { %v374_v37 = vadd.f32 %v373_v35, %v372_v36  ;;  %v385_v14 = vadd.f32 %v383_v44, %v381_v42  ;;  %v393_v57 = vadd.f32 %v392_v53, %v310_v5 }
  0xc9   :  { %v443_v12 = vshrl.u32 %v442_v2, 7 }
  0xca   :  { %v535_v38 = vmul.f32 -1.442695, %v374_v37  ;;  %v536_v47 = vmul.f32 -1.442695, %v385_v14 }
  0xcb   :  { %v444_v17 = vsub.s32 0, %v443_v12 }
  0xcc   :  { %567 = vpow2.f32 %v535_v38 }
  0xcd   :  { %v564_v39 = vpop.eup %563 }
  0xce   :  { %v360_v40 = vsub.f32 0.0, %v564_v39  ;;  %v566_v41 = vpop.eup %565 }
  0xd0   :  { %v361_v9 = vmul.f32 %v566_v41, %v360_v40 }
  0xd2   :  { %v362_v45 = vadd.f32 %v564_v39, %v361_v9 }
  0xd4   :  { %v412_v46 = vmul.f32 %v362_v45, %v330_v54  ;;  %v420_v50 = vmul.f32 %v362_v45, %v339_v63  ;;  %v431_v63 = vmul.f32 %v362_v45, %v351_v18  ;;  %v454_v27 = vrot.slane %v362_v45, %v444_v17 }
  0xd6   :  { %v413_v43 = vadd.f32 %v412_v46, %v411_v19  ;;  %v424_v52 = vadd.f32 %v422_v51, %v420_v50  ;;  %v432_v3 = vadd.f32 %v431_v63, %v353_v21 }
  0xd8   :  { %v537_v48 = vmul.f32 -1.442695, %v413_v43  ;;  %v538_v55 = vmul.f32 -1.442695, %v424_v52 }
  0xd9   :  { %v568_v25 = vpop.eup %567 }
  0xda   :  { %v378_v49 = vadd.f32 1.0, %v568_v25  ;;  %569 = vpow2.f32 %v537_v48 }
  0xdb   :  { %571 = vpow2.f32 %v536_v47 }
  0xdc   :  { %573 = vrcp.f32 %v378_v49 }
  0xdd   :  { %575 = vpow2.f32 %v538_v55 }
  0xe7   :  { %v570_v56 = vpop.eup %569 }
  0xe8   :  { %v572_v54 = vpop.eup %571  ;;  %v417_v58 = vadd.f32 1.0, %v570_v56 }
  0xe9   :  { %v574_v59 = vpop.eup %573  ;;  %v389_v62 = vadd.f32 1.0, %v572_v54 }
  0xea   :  { %v394_v60 = vmul.f32 %v574_v59, %v393_v57  ;;  %577 = vrcp.f32 %v417_v58  ;;  %v576_v1 = vpop.eup %575 }
  0xeb   :  { %v428_v8 = vadd.f32 1.0, %v576_v1 }
  0xec   :  { %v397_v0 = vadd.f32 %v395_v61, %v394_v60 }
  0xee   :  { %579 = vtanh.f32 %v397_v0 }
  0xef   :  { %581 = vrcp.f32 %v389_v62 }
  0xf7   :  { %v578_v4 = vpop.eup %577 }
  0xf8   :  { %v433_v6 = vmul.f32 %v578_v4, %v432_v3 }
  0xfa   :  { %v436_v10 = vadd.f32 %v434_v7, %v433_v6 }
  0xfb   :  { %v580_v5 = vpop.eup %579 }
  0xfc   :  { %v399_v11 = vsub.f32 %v878_v34, %v580_v5  ;;  %583 = vtanh.f32 %v436_v10  ;;  %v582_v13 = vpop.eup %581 }
  0xfd   :  { %585 = vrcp.f32 %v428_v8 }
  0xfe   :  { %v400_v15 = vmul.f32 %v582_v13, %v399_v11 }
 0x100   :  { %v401_v16 = vadd.f32 %v580_v5, %v400_v15 }
 0x102   :  { %v445_v18 = vrot.slane %v401_v16, %v444_v17 }
 0x104   :  { %v448_v20 = vsel %vm447_vm0, %v878_v34, %v445_v18 }
 0x105   :  { %449 = vst [vmem:[#allocation16] sm:$0x3] %v448_v20 }
 0x109   :  { %v584_v21 = vpop.eup %583 }
 0x10a   :  { %v438_v22 = vsub.f32 %v362_v45, %v584_v21  ;;  %v586_v23 = vpop.eup %585 }
 0x10c   :  { %v439_v24 = vmul.f32 %v586_v23, %v438_v22 }
 0x10e   :  { %v440_v26 = vadd.f32 %v584_v21, %v439_v24 }
 0x110   :  { %v456_v28 = vsel %vm447_vm0, %v440_v26, %v454_v27 }
 0x111   :  { %458 = vst [vmem:[#allocation16 + $0x2] sm:$0x3] %v456_v28 }
 0x112   :  { %690 = shalt.err (!%p687_p11)
}
 0x113   :  { %468 = dma.vmem_to_hbm [thread:$0]  %s466_s24, 64, %s907_s7, [#allocation5]  }
 0x114   :  { %709 = dma.done.wait [#allocation5], 64  }
 0x115   :  { %710 = vsyncadd [#allocation5], 4294967232 }
 0x116   :  { %472 = vsyncpa [#allocation4], 1 }
 0x117   :  { %473 = vsyncpa [#allocation5], 1 }
 0x118   :  { %474 = vsyncpa [#allocation6], 1 }
 0x119   :  { %475 = vsyncpa [#allocation9], 1 }
 0x11a   :  { %476 = vsyncpa [#allocation12], 1 }
 0x11b   :  { %477 = vsyncpa [#allocation15], 1 }

</bundles_post_ra>
